<compile_context>
chip_gen: v5e
topology: v5e:2x2
jax: 0.10.0
libtpu: 0.0.40
codegen_flags: <defaults>
</compile_context>

<pallas_src>
from functools import partial

import jax
import jax.numpy as jnp
from jax import lax
from jax.experimental import pallas as pl
from jax.experimental.pallas import tpu as pltpu

_LANE = 128
_MAX_LANE_BLOCK = 4096


def _smooth_avg_pool_kernel(x_ref, o_ref, rs_ref, *, k, pad):
    """One lane-block of stride-1 avg_pool2d with count_include_pad=False.

    x_ref : (H,  W,  bc)  input tile (channels-last)
    o_ref : (Ho, Wo, bc)  output tile
    rs_ref: (H,  Wo, bc)  f32 scratch holding W-direction window means
    """
    H, W = x_ref.shape[0], x_ref.shape[1]
    Ho, Wo = o_ref.shape[0], o_ref.shape[1]
    f32 = jnp.float32

    # ---- W-direction (sublane axis) window sum, 1/cols folded in ------------
    # Interior columns (all k taps valid): k shifted full-width loads, value adds,
    # one store. Divisor is the constant k.
    w_lo, w_hi = pad, W - k + pad                       # inclusive interior range
    if w_hi >= w_lo:
        Wi = w_hi - w_lo + 1
        s = x_ref[:, 0:Wi, :].astype(f32)
        for d in range(1, k):
            s = s + x_ref[:, d:d + Wi, :].astype(f32)
        rs_ref[:, w_lo:w_lo + Wi, :] = s * (1.0 / k)
    # Clipped boundary columns: tiny fix-up stores, divisor = #valid taps.
    for j in range(Wo):
        if w_lo <= j <= w_hi:
            continue
        c0, c1 = max(j - pad, 0), min(j - pad + k, W)
        s = x_ref[:, c0:c0 + 1, :].astype(f32)
        for c in range(c0 + 1, c1):
            s = s + x_ref[:, c:c + 1, :].astype(f32)
        rs_ref[:, j:j + 1, :] = s * (1.0 / (c1 - c0))

    # ---- H-direction (major axis) window sum, 1/rows folded in --------------
    h_lo, h_hi = pad, H - k + pad
    if h_hi >= h_lo:
        Hi = h_hi - h_lo + 1
        s = rs_ref[0:Hi, :, :]
        for d in range(1, k):
            s = s + rs_ref[d:d + Hi, :, :]
        o_ref[h_lo:h_lo + Hi, :, :] = (s * (1.0 / k)).astype(o_ref.dtype)
    for i in range(Ho):
        if h_lo <= i <= h_hi:
            continue
        r0, r1 = max(i - pad, 0), min(i - pad + k, H)
        s = rs_ref[r0:r0 + 1, :, :]
        for r in range(r0 + 1, r1):
            s = s + rs_ref[r:r + 1, :, :]
        o_ref[i:i + 1, :, :] = (s * (1.0 / (r1 - r0))).astype(o_ref.dtype)


def _tpu_vmem_capacity_bytes():
    """Per-core VMEM capacity; conservative (v7x-sized) fallback if unavailable."""
    try:
        info = pltpu.get_tpu_info()
        cap = getattr(info, "vmem_capacity_bytes", None)
        if cap:
            return int(cap)
    except Exception:
        pass
    return 64 * 1024 * 1024


def _plan_lane_blocks(NC, H, W, Ho, Wo, in_itemsize, out_itemsize):
    """Lane-block width (multiple of 128, or all of NC when NC<=128) and the VMEM
    limit, sized per TPU generation from the queried VMEM capacity."""
    cap = _tpu_vmem_capacity_bytes()
    budget = cap // 3                           # headroom under the scoped limit
    per_lane = (2 * H * W * in_itemsize         # double-buffered input block
                + 2 * Ho * Wo * out_itemsize    # double-buffered output block
                + H * Wo * 4)                   # f32 row-sum scratch
    if NC <= _LANE:
        bc = NC                                 # single (lane-sparse) block
    else:
        groups = pl.cdiv(NC, _LANE)             # NC measured in 128-lane groups
        max_groups = min(_MAX_LANE_BLOCK // _LANE,
                         max(1, budget // (per_lane * _LANE)))
        nb = pl.cdiv(groups, max_groups)
        if nb == 1 and groups >= 2:
            nb = 2      # >=2 balanced blocks: pipeline overlap + v7x megacore
        elif nb > 1 and nb % 2 == 1 and groups > nb:
            nb += 1     # even block count for 2-TensorCore balance
        bc = pl.cdiv(groups, nb) * _LANE
    needed = per_lane * bc
    vmem_limit = int(min(cap - (2 << 20), max(cap // 2, (needed * 3) // 2)))
    return bc, vmem_limit


def _pool_channels_last(x_cl, k):
    """stride-1, pad=k//2, count_include_pad=False avg pool on an (H, W, C) array
    whose trailing (fused channel) axis is the lane axis."""
    H, W, NC = x_cl.shape
    pad = k // 2
    Ho = H + 2 * pad - k + 1
    Wo = W + 2 * pad - k + 1
    isz = jnp.dtype(x_cl.dtype).itemsize
    bc, vmem_limit = _plan_lane_blocks(NC, H, W, Ho, Wo, isz, isz)
    # TODO(synk): for very large H*W planes (v7x 64 MiB VMEM) add an H grid axis with
    # a (k-1)-row halo instead of relying on the full plane fitting one block.
    grid = (pl.cdiv(NC, bc),)        # ragged last block: lanes independent, OOB writes masked
    kern = partial(_smooth_avg_pool_kernel, k=k, pad=pad)
    return pl.pallas_call(
        kern,
        out_shape=jax.ShapeDtypeStruct((Ho, Wo, NC), x_cl.dtype),
        grid=grid,
        in_specs=[pl.BlockSpec((H, W, bc), lambda i: (0, 0, i))],
        out_specs=pl.BlockSpec((Ho, Wo, bc), lambda i: (0, 0, i)),
        scratch_shapes=[pltpu.VMEM((H, Wo, bc), jnp.float32)],
        compiler_params=pltpu.CompilerParams(
            dimension_semantics=("parallel",),   # megacore shard on v7x
            vmem_limit_bytes=vmem_limit,         # per-generation scoped VMEM
        ),
    )(x_cl)


@partial(jax.jit, static_argnums=(1,))
def smoothing_avg_pooling_channels_last(x_hwc, kernel_size):
    """Fast path for inputs already in (H, W, C) layout: no relayout passes."""
    return _pool_channels_last(x_hwc, int(kernel_size))


@partial(jax.jit, static_argnums=(1,))
def smoothing_avg_pooling(x, kernel_size):
    """Equivalent of SmoothingAvgPooling(kernel_size)(x) for NCHW input x."""
    N, C, H, W = x.shape
    k = int(kernel_size)
    # Channels-last relayout so the fused N*C axis is lane-dense inside the kernel.
    # TODO(synk): fold this relayout into the kernel (strided DMA / in-VMEM transpose)
    # when the caller cannot use the channels-last fast path above.
    x_cl = jnp.transpose(x.reshape(N * C, H, W), (1, 2, 0))
    out_cl = _pool_channels_last(x_cl, k)
    Ho, Wo = out_cl.shape[0], out_cl.shape[1]
    return jnp.transpose(out_cl, (2, 0, 1)).reshape(N, C, Ho, Wo)


def _reference_avg_pool(x, kernel_size):
    """Pure-JAX reference matching F.avg_pool2d(..., stride=1, padding=k//2,
    count_include_pad=False)."""
    k = int(kernel_size)
    pad = k // 2
    dims = (1, 1, k, k)
    strides = (1, 1, 1, 1)
    padding = ((0, 0), (0, 0), (pad, pad), (pad, pad))
    sums = lax.reduce_window(x, 0.0, lax.add, dims, strides, padding)
    cnts = lax.reduce_window(jnp.ones_like(x), 0.0, lax.add, dims, strides, padding)
    return sums / cnts


def _check(x, kernel_size):
    y = jax.block_until_ready(smoothing_avg_pooling(x, kernel_size))
    y_ref = _reference_avg_pool(x, kernel_size)
    assert y.shape == y_ref.shape, (y.shape, y_ref.shape)
    assert jnp.allclose(y, y_ref, atol=1e-5, rtol=1e-5), \
        f"mismatch vs reference (k={kernel_size}, shape={x.shape})"


if __name__ == "__main__":
    key = jax.random.PRNGKey(0)
    k1, k2, k3 = jax.random.split(key, 3)

    # Primary case: SmoothingAvgPooling(kernel_size=3) on (2, 4, 16, 16).
    x = jax.random.normal(k1, (2, 4, 16, 16), dtype=jnp.float32)
    _check(x, 3)

    # Even kernel size (Ho = H + 1): exercises the clipped-boundary fix-up path.
    x2 = jax.random.normal(k2, (1, 6, 8, 8), dtype=jnp.float32)
    _check(x2, 2)

    # Large fused channel count (NC = 1200): balanced multi-block grid (2 x 640)
    # with a ragged, write-masked last block and no host-side padding pass.
    x3 = jax.random.normal(k3, (2, 600, 8, 8), dtype=jnp.float32)
    _check(x3, 3)

    print("KERNEL_OK")
</pallas_src>

<mosaic_0001>
module attributes {stable_mosaic.version = 11 : i64} {
  func.func @_smooth_avg_pool_kernel(%arg0: i32, %arg1: memref<16x16x8xf32, #tpu.memory_space<vmem>>, %arg2: memref<16x16x8xf32, #tpu.memory_space<vmem>>, %arg3: memref<16x16x8xf32, #tpu.memory_space<vmem>>) attributes {dimension_semantics = [#tpu.dimension_semantics<parallel>], iteration_bounds = array<i64: 1>, scalar_prefetch = 0 : i64, scratch_operands = 1 : i64, tpu.core_type = #tpu.core_type<tc>, window_params = [{transform_indices = @transform_0, window_bounds = array<i64: 16, 16, 8>}, {transform_indices = @transform_1, window_bounds = array<i64: 16, 16, 8>}]} {
    %c0 = arith.constant 0 : index
    %c0_0 = arith.constant 0 : index
    %c0_1 = arith.constant 0 : index
    %0 = vector.load %arg1[%c0, %c0_0, %c0_1] : memref<16x16x8xf32, #tpu.memory_space<vmem>>, vector<16x14x8xf32>
    %c0_2 = arith.constant 0 : index
    %c1 = arith.constant 1 : index
    %c0_3 = arith.constant 0 : index
    %1 = vector.load %arg1[%c0_2, %c1, %c0_3] : memref<16x16x8xf32, #tpu.memory_space<vmem>>, vector<16x14x8xf32>
    %2 = arith.addf %0, %1 : vector<16x14x8xf32>
    %c0_4 = arith.constant 0 : index
    %c2 = arith.constant 2 : index
    %c0_5 = arith.constant 0 : index
    %3 = vector.load %arg1[%c0_4, %c2, %c0_5] : memref<16x16x8xf32, #tpu.memory_space<vmem>>, vector<16x14x8xf32>
    %4 = arith.addf %2, %3 : vector<16x14x8xf32>
    %cst = arith.constant 0.333333343 : f32
    %5 = vector.broadcast %cst : f32 to vector<16x14x8xf32>
    %6 = arith.mulf %4, %5 : vector<16x14x8xf32>
    %c0_6 = arith.constant 0 : index
    %c1_7 = arith.constant 1 : index
    %c0_8 = arith.constant 0 : index
    %7 = vector.load %arg3[%c0_6, %c1_7, %c0_8] : memref<16x16x8xf32, #tpu.memory_space<vmem>>, vector<16x14x8xf32>
    tpu.vector_store %arg3[%c0_6, %c1_7, %c0_8], %6 {strides = array<i32>} : memref<16x16x8xf32, #tpu.memory_space<vmem>>, vector<16x14x8xf32>,
    %c0_9 = arith.constant 0 : index
    %c0_10 = arith.constant 0 : index
    %c0_11 = arith.constant 0 : index
    %8 = vector.load %arg1[%c0_9, %c0_10, %c0_11] : memref<16x16x8xf32, #tpu.memory_space<vmem>>, vector<16x1x8xf32>
    %c0_12 = arith.constant 0 : index
    %c1_13 = arith.constant 1 : index
    %c0_14 = arith.constant 0 : index
    %9 = vector.load %arg1[%c0_12, %c1_13, %c0_14] : memref<16x16x8xf32, #tpu.memory_space<vmem>>, vector<16x1x8xf32>
    %10 = arith.addf %8, %9 : vector<16x1x8xf32>
    %cst_15 = arith.constant 5.000000e-01 : f32
    %11 = vector.broadcast %cst_15 : f32 to vector<16x1x8xf32>
    %12 = arith.mulf %10, %11 : vector<16x1x8xf32>
    %c0_16 = arith.constant 0 : index
    %c0_17 = arith.constant 0 : index
    %c0_18 = arith.constant 0 : index
    %13 = vector.load %arg3[%c0_16, %c0_17, %c0_18] : memref<16x16x8xf32, #tpu.memory_space<vmem>>, vector<16x1x8xf32>
    tpu.vector_store %arg3[%c0_16, %c0_17, %c0_18], %12 {strides = array<i32>} : memref<16x16x8xf32, #tpu.memory_space<vmem>>, vector<16x1x8xf32>,
    %c0_19 = arith.constant 0 : index
    %c14 = arith.constant 14 : index
    %c0_20 = arith.constant 0 : index
    %14 = vector.load %arg1[%c0_19, %c14, %c0_20] : memref<16x16x8xf32, #tpu.memory_space<vmem>>, vector<16x1x8xf32>
    %c0_21 = arith.constant 0 : index
    %c15 = arith.constant 15 : index
    %c0_22 = arith.constant 0 : index
    %15 = vector.load %arg1[%c0_21, %c15, %c0_22] : memref<16x16x8xf32, #tpu.memory_space<vmem>>, vector<16x1x8xf32>
    %16 = arith.addf %14, %15 : vector<16x1x8xf32>
    %cst_23 = arith.constant 5.000000e-01 : f32
    %17 = vector.broadcast %cst_23 : f32 to vector<16x1x8xf32>
    %18 = arith.mulf %16, %17 : vector<16x1x8xf32>
    %c0_24 = arith.constant 0 : index
    %c15_25 = arith.constant 15 : index
    %c0_26 = arith.constant 0 : index
    %19 = vector.load %arg3[%c0_24, %c15_25, %c0_26] : memref<16x16x8xf32, #tpu.memory_space<vmem>>, vector<16x1x8xf32>
    tpu.vector_store %arg3[%c0_24, %c15_25, %c0_26], %18 {strides = array<i32>} : memref<16x16x8xf32, #tpu.memory_space<vmem>>, vector<16x1x8xf32>,
    %c0_27 = arith.constant 0 : index
    %c0_28 = arith.constant 0 : index
    %c0_29 = arith.constant 0 : index
    %20 = vector.load %arg3[%c0_27, %c0_28, %c0_29] : memref<16x16x8xf32, #tpu.memory_space<vmem>>, vector<14x16x8xf32>
    %c1_30 = arith.constant 1 : index
    %c0_31 = arith.constant 0 : index
    %c0_32 = arith.constant 0 : index
    %21 = vector.load %arg3[%c1_30, %c0_31, %c0_32] : memref<16x16x8xf32, #tpu.memory_space<vmem>>, vector<14x16x8xf32>
    %22 = arith.addf %20, %21 : vector<14x16x8xf32>
    %c2_33 = arith.constant 2 : index
    %c0_34 = arith.constant 0 : index
    %c0_35 = arith.constant 0 : index
    %23 = vector.load %arg3[%c2_33, %c0_34, %c0_35] : memref<16x16x8xf32, #tpu.memory_space<vmem>>, vector<14x16x8xf32>
    %24 = arith.addf %22, %23 : vector<14x16x8xf32>
    %cst_36 = arith.constant 0.333333343 : f32
    %25 = vector.broadcast %cst_36 : f32 to vector<14x16x8xf32>
    %26 = arith.mulf %24, %25 : vector<14x16x8xf32>
    %c1_37 = arith.constant 1 : index
    %c0_38 = arith.constant 0 : index
    %c0_39 = arith.constant 0 : index
    %27 = vector.load %arg2[%c1_37, %c0_38, %c0_39] : memref<16x16x8xf32, #tpu.memory_space<vmem>>, vector<14x16x8xf32>
    tpu.vector_store %arg2[%c1_37, %c0_38, %c0_39], %26 {strides = array<i32>} : memref<16x16x8xf32, #tpu.memory_space<vmem>>, vector<14x16x8xf32>,
    %c0_40 = arith.constant 0 : index
    %c0_41 = arith.constant 0 : index
    %c0_42 = arith.constant 0 : index
    %28 = vector.load %arg3[%c0_40, %c0_41, %c0_42] : memref<16x16x8xf32, #tpu.memory_space<vmem>>, vector<1x16x8xf32>
    %c1_43 = arith.constant 1 : index
    %c0_44 = arith.constant 0 : index
    %c0_45 = arith.constant 0 : index
    %29 = vector.load %arg3[%c1_43, %c0_44, %c0_45] : memref<16x16x8xf32, #tpu.memory_space<vmem>>, vector<1x16x8xf32>
    %30 = arith.addf %28, %29 : vector<1x16x8xf32>
    %cst_46 = arith.constant 5.000000e-01 : f32
    %31 = vector.broadcast %cst_46 : f32 to vector<1x16x8xf32>
    %32 = arith.mulf %30, %31 : vector<1x16x8xf32>
    %c0_47 = arith.constant 0 : index
    %c0_48 = arith.constant 0 : index
    %c0_49 = arith.constant 0 : index
    %33 = vector.load %arg2[%c0_47, %c0_48, %c0_49] : memref<16x16x8xf32, #tpu.memory_space<vmem>>, vector<1x16x8xf32>
    tpu.vector_store %arg2[%c0_47, %c0_48, %c0_49], %32 {strides = array<i32>} : memref<16x16x8xf32, #tpu.memory_space<vmem>>, vector<1x16x8xf32>,
    %c14_50 = arith.constant 14 : index
    %c0_51 = arith.constant 0 : index
    %c0_52 = arith.constant 0 : index
    %34 = vector.load %arg3[%c14_50, %c0_51, %c0_52] : memref<16x16x8xf32, #tpu.memory_space<vmem>>, vector<1x16x8xf32>
    %c15_53 = arith.constant 15 : index
    %c0_54 = arith.constant 0 : index
    %c0_55 = arith.constant 0 : index
    %35 = vector.load %arg3[%c15_53, %c0_54, %c0_55] : memref<16x16x8xf32, #tpu.memory_space<vmem>>, vector<1x16x8xf32>
    %36 = arith.addf %34, %35 : vector<1x16x8xf32>
    %cst_56 = arith.constant 5.000000e-01 : f32
    %37 = vector.broadcast %cst_56 : f32 to vector<1x16x8xf32>
    %38 = arith.mulf %36, %37 : vector<1x16x8xf32>
    %c15_57 = arith.constant 15 : index
    %c0_58 = arith.constant 0 : index
    %c0_59 = arith.constant 0 : index
    %39 = vector.load %arg2[%c15_57, %c0_58, %c0_59] : memref<16x16x8xf32, #tpu.memory_space<vmem>>, vector<1x16x8xf32>
    tpu.vector_store %arg2[%c15_57, %c0_58, %c0_59], %38 {strides = array<i32>} : memref<16x16x8xf32, #tpu.memory_space<vmem>>, vector<1x16x8xf32>,
    return
  }
  func.func @transform_0(%arg0: i32) -> (i32, i32, i32) {
    %c0_i32 = arith.constant 0 : i32
    %c0_i32_0 = arith.constant 0 : i32
    %c0_i32_1 = arith.constant 0 : i32
    return %c0_i32, %c0_i32_0, %arg0 : i32, i32, i32
  }
  func.func @transform_1(%arg0: i32) -> (i32, i32, i32) {
    %c0_i32 = arith.constant 0 : i32
    %c0_i32_0 = arith.constant 0 : i32
    %c0_i32_1 = arith.constant 0 : i32
    return %c0_i32, %c0_i32_0, %arg0 : i32, i32, i32
  }
}

</mosaic_0001>

<bundles_post_ra>
// kernel: smoothing_avg_pooling.1
= control target key start
LH: loop header
LB: loop body
LE: loop exit
PB: predicated region body
PF: predicated region fallthrough
CT: control target
= control target key end

     0   :  { %vm200_vm0 = vcmask 64512   ;;  %vm202_vm1 = vcmask 62464   ;;  %vm298_vm2 = vcmask 57344   ;;  %s1359_s0 = inlined_call_operand.vmem [shape: f32[16,16,8], index: 0, kind: input, shape index: {}]   ;;  %s1360_s1 = inlined_call_operand.vmem [shape: f32[16,16,8], index: 1, kind: output, shape index: {}]  }
   0x1   :  { %v8_v0 = vld [vmem:[%s1359_s0] sm:$0xff]  ;;  %v9_v4 = vld [vmem:[%s1359_s0 + $0x8] sm:$0x3f]  ;;  %v10_v8 = vld [vmem:[%s1359_s0 + $0x10] sm:$0xff] }
   0x2   :  { %v40_v1 = vld [vmem:[%s1359_s0 + $0x1] sm:$0xff]  ;;  %v41_v5 = vld [vmem:[%s1359_s0 + $0x9] sm:$0x3f]  ;;  %v42_v9 = vld [vmem:[%s1359_s0 + $0x11] sm:$0xff] }
   0x3   :  { %v104_v2 = vld [vmem:[%s1359_s0 + $0x2] sm:$0xff]  ;;  %v72_v3 = vadd.f32 %v40_v1, %v8_v0  ;;  %v105_v6 = vld [vmem:[%s1359_s0 + $0xa] sm:$0x3f]  ;;  %v73_v7 = vadd.f32 %v41_v5, %v9_v4  ;;  %v106_v10 = vld [vmem:[%s1359_s0 + $0x12] sm:$0xff]  ;;  %v74_v12 = vadd.f32 %v42_v9, %v10_v8 }
   0x4   :  { %v11_v13 = vld [vmem:[%s1359_s0 + $0x18] sm:$0x3f]  ;;  %v12_v18 = vld [vmem:[%s1359_s0 + $0x20] sm:$0xff]  ;;  %v13_v24 = vld [vmem:[%s1359_s0 + $0x28] sm:$0x3f] }
   0x5   :  { %v136_v11 = vadd.f32 %v104_v2, %v72_v3  ;;  %v43_v14 = vld [vmem:[%s1359_s0 + $0x19] sm:$0x3f]  ;;  %v137_v16 = vadd.f32 %v105_v6, %v73_v7  ;;  %v44_v19 = vld [vmem:[%s1359_s0 + $0x21] sm:$0xff]  ;;  %v138_v22 = vadd.f32 %v106_v10, %v74_v12  ;;  %v45_v25 = vld [vmem:[%s1359_s0 + $0x29] sm:$0x3f] }
   0x6   :  { %v107_v15 = vld [vmem:[%s1359_s0 + $0x1a] sm:$0x3f]  ;;  %v75_v17 = vadd.f32 %v43_v14, %v11_v13  ;;  %v108_v20 = vld [vmem:[%s1359_s0 + $0x22] sm:$0xff]  ;;  %v76_v23 = vadd.f32 %v44_v19, %v12_v18  ;;  %v77_v28 = vadd.f32 %v45_v25, %v13_v24  ;;  %v109_v29 = vld [vmem:[%s1359_s0 + $0x2a] sm:$0x3f] }
   0x7   :  { %v168_v21 = vmul.f32 0.33333334, %v136_v11  ;;  %v169_v26 = vmul.f32 0.33333334, %v137_v16  ;;  %v14_v30 = vld [vmem:[%s1359_s0 + $0x30] sm:$0xff]  ;;  %v16_v44 = vld [vmem:[%s1359_s0 + $0x40] sm:$0xff] }
   0x8   :  { %v139_v27 = vadd.f32 %v107_v15, %v75_v17  ;;  %v46_v31 = vld [vmem:[%s1359_s0 + $0x31] sm:$0xff]  ;;  %v170_v32 = vmul.f32 0.33333334, %v138_v22  ;;  %v140_v33 = vadd.f32 %v108_v20, %v76_v23  ;;  %v141_v38 = vadd.f32 %v109_v29, %v77_v28  ;;  %v47_v39 = vld [vmem:[%s1359_s0 + $0x39] sm:$0x3f]  ;;  %v48_v46 = vld [vmem:[%s1359_s0 + $0x41] sm:$0xff] }
   0x9   :  { %201 = vst.msk [vmem:[#allocation2 + $0x1] sm:$0xff] %vm200_vm0, %v168_v21  ;;  %v78_v34 = vadd.f32 %v46_v31, %v14_v30  ;;  %v110_v35 = vld [vmem:[%s1359_s0 + $0x32] sm:$0xff]  ;;  %v111_v43 = vld [vmem:[%s1359_s0 + $0x3a] sm:$0x3f]  ;;  %v112_v47 = vld [vmem:[%s1359_s0 + $0x42] sm:$0xff]  ;;  %v80_v50 = vadd.f32 %v48_v46, %v16_v44 }
   0xa   :  { %v15_v36 = vld [vmem:[%s1359_s0 + $0x38] sm:$0x3f]  ;;  %203 = vst.msk [vmem:[#allocation2 + $0x9] sm:$0x3f] %vm202_vm1, %v169_v26  ;;  %v171_v37 = vmul.f32 0.33333334, %v139_v27 }
   0xb   :  { %204 = vst.msk [vmem:[#allocation2 + $0x11] sm:$0xff] %vm200_vm0, %v170_v32  ;;  %v172_v40 = vmul.f32 0.33333334, %v140_v33  ;;  %v142_v41 = vadd.f32 %v110_v35, %v78_v34  ;;  %v79_v42 = vadd.f32 %v47_v39, %v15_v36  ;;  %v173_v45 = vmul.f32 0.33333334, %v141_v38  ;;  %v18_v52 = vld [vmem:[%s1359_s0 + $0x50] sm:$0xff] }
   0xc   :  { %205 = vst.msk [vmem:[#allocation2 + $0x19] sm:$0x3f] %vm202_vm1, %v171_v37  ;;  %v17_v51 = vld [vmem:[%s1359_s0 + $0x48] sm:$0x3f]  ;;  %v144_v56 = vadd.f32 %v112_v47, %v80_v50  ;;  %v50_v58 = vld [vmem:[%s1359_s0 + $0x51] sm:$0xff]  ;;  %v20_v60 = vld [vmem:[%s1359_s0 + $0x60] sm:$0xff] }
   0xd   :  { %206 = vst.msk [vmem:[#allocation2 + $0x21] sm:$0xff] %vm200_vm0, %v172_v40  ;;  %v174_v48 = vmul.f32 0.33333334, %v142_v41  ;;  %v143_v49 = vadd.f32 %v111_v43, %v79_v42  ;;  %v49_v53 = vld [vmem:[%s1359_s0 + $0x49] sm:$0x3f]  ;;  %v114_v59 = vld [vmem:[%s1359_s0 + $0x52] sm:$0xff]  ;;  %v82_v61 = vadd.f32 %v50_v58, %v18_v52 }
   0xe   :  { %207 = vst.msk [vmem:[#allocation2 + $0x29] sm:$0x3f] %vm202_vm1, %v173_v45  ;;  %v113_v54 = vld [vmem:[%s1359_s0 + $0x4a] sm:$0x3f]  ;;  %v81_v57 = vadd.f32 %v49_v53, %v17_v51  ;;  %v19_v62 = vld [vmem:[%s1359_s0 + $0x58] sm:$0x3f] }
   0xf   :  { %208 = vst.msk [vmem:[#allocation2 + $0x31] sm:$0xff] %vm200_vm0, %v174_v48  ;;  %v175_v55 = vmul.f32 0.33333334, %v143_v49  ;;  %v51_v63 = vld [vmem:[%s1359_s0 + $0x59] sm:$0x3f]  ;;  %v52_v4 = vld [vmem:[%s1359_s0 + $0x61] sm:$0xff]  ;;  %v146_v6 = vadd.f32 %v114_v59, %v82_v61 }
  0x10   :  { %v115_v0 = vld [vmem:[%s1359_s0 + $0x5a] sm:$0x3f]  ;;  %v176_v1 = vmul.f32 0.33333334, %v144_v56  ;;  %v145_v2 = vadd.f32 %v113_v54, %v81_v57  ;;  %v83_v3 = vadd.f32 %v51_v63, %v19_v62  ;;  %v116_v5 = vld [vmem:[%s1359_s0 + $0x62] sm:$0xff]  ;;  %v84_v7 = vadd.f32 %v52_v4, %v20_v60  ;;  %v22_v14 = vld [vmem:[%s1359_s0 + $0x70] sm:$0xff] }
  0x11   :  { %209 = vst.msk [vmem:[#allocation2 + $0x39] sm:$0x3f] %vm202_vm1, %v175_v55  ;;  %v21_v8 = vld [vmem:[%s1359_s0 + $0x68] sm:$0x3f]  ;;  %v54_v15 = vld [vmem:[%s1359_s0 + $0x71] sm:$0xff]  ;;  %v24_v28 = vld [vmem:[%s1359_s0 + $0x80] sm:$0xff] }
  0x12   :  { %v53_v9 = vld [vmem:[%s1359_s0 + $0x69] sm:$0x3f]  ;;  %210 = vst.msk [vmem:[#allocation2 + $0x41] sm:$0xff] %vm200_vm0, %v176_v1  ;;  %v177_v11 = vmul.f32 0.33333334, %v145_v2  ;;  %v147_v12 = vadd.f32 %v115_v0, %v83_v3  ;;  %v118_v16 = vld [vmem:[%s1359_s0 + $0x72] sm:$0xff]  ;;  %v148_v18 = vadd.f32 %v116_v5, %v84_v7  ;;  %v86_v19 = vadd.f32 %v54_v15, %v22_v14 }
  0x13   :  { %v117_v10 = vld [vmem:[%s1359_s0 + $0x6a] sm:$0x3f]  ;;  %v85_v13 = vadd.f32 %v53_v9, %v21_v8  ;;  %v178_v17 = vmul.f32 0.33333334, %v146_v6  ;;  %v23_v20 = vld [vmem:[%s1359_s0 + $0x78] sm:$0x3f] }
  0x14   :  { %v55_v21 = vld [vmem:[%s1359_s0 + $0x79] sm:$0x3f]  ;;  %211 = vst.msk [vmem:[#allocation2 + $0x49] sm:$0x3f] %vm202_vm1, %v177_v11  ;;  %v179_v22 = vmul.f32 0.33333334, %v147_v12  ;;  %v150_v27 = vadd.f32 %v118_v16, %v86_v19 }
  0x15   :  { %v149_v23 = vadd.f32 %v117_v10, %v85_v13  ;;  %v87_v24 = vadd.f32 %v55_v21, %v23_v20  ;;  %v119_v25 = vld [vmem:[%s1359_s0 + $0x7a] sm:$0x3f]  ;;  %212 = vst.msk [vmem:[#allocation2 + $0x51] sm:$0xff] %vm200_vm0, %v178_v17  ;;  %v180_v26 = vmul.f32 0.33333334, %v148_v18  ;;  %v56_v29 = vld [vmem:[%s1359_s0 + $0x81] sm:$0xff] }
  0x16   :  { %v120_v30 = vld [vmem:[%s1359_s0 + $0x82] sm:$0xff]  ;;  %213 = vst.msk [vmem:[#allocation2 + $0x59] sm:$0x3f] %vm202_vm1, %v179_v22  ;;  %v88_v33 = vadd.f32 %v56_v29, %v24_v28  ;;  %v182_v35 = vmul.f32 0.33333334, %v150_v27  ;;  %v26_v37 = vld [vmem:[%s1359_s0 + $0x90] sm:$0xff] }
  0x17   :  { %v181_v31 = vmul.f32 0.33333334, %v149_v23  ;;  %v151_v32 = vadd.f32 %v119_v25, %v87_v24  ;;  %v25_v34 = vld [vmem:[%s1359_s0 + $0x88] sm:$0x3f]  ;;  %214 = vst.msk [vmem:[#allocation2 + $0x61] sm:$0xff] %vm200_vm0, %v180_v26  ;;  %v58_v42 = vld [vmem:[%s1359_s0 + $0x91] sm:$0xff] }
  0x18   :  { %v57_v36 = vld [vmem:[%s1359_s0 + $0x89] sm:$0x3f]  ;;  %v152_v39 = vadd.f32 %v120_v30, %v88_v33  ;;  %216 = vst.msk [vmem:[#allocation2 + $0x71] sm:$0xff] %vm200_vm0, %v182_v35  ;;  %v122_v43 = vld [vmem:[%s1359_s0 + $0x92] sm:$0xff]  ;;  %v90_v47 = vadd.f32 %v58_v42, %v26_v37  ;;  %v123_v50 = vld [vmem:[%s1359_s0 + $0x9a] sm:$0x3f] }
  0x19   :  { %215 = vst.msk [vmem:[#allocation2 + $0x69] sm:$0x3f] %vm202_vm1, %v181_v31  ;;  %v183_v38 = vmul.f32 0.33333334, %v151_v32  ;;  %v89_v40 = vadd.f32 %v57_v36, %v25_v34  ;;  %v121_v41 = vld [vmem:[%s1359_s0 + $0x8a] sm:$0x3f] }
  0x1a   :  { %v27_v44 = vld [vmem:[%s1359_s0 + $0x98] sm:$0x3f]  ;;  %v184_v45 = vmul.f32 0.33333334, %v152_v39  ;;  %v28_v51 = vld [vmem:[%s1359_s0 + $0xa0] sm:$0xff]  ;;  %v154_v54 = vadd.f32 %v122_v43, %v90_v47  ;;  %v30_v61 = vld [vmem:[%s1359_s0 + $0xb0] sm:$0xff] }
  0x1b   :  { %217 = vst.msk [vmem:[#allocation2 + $0x79] sm:$0x3f] %vm202_vm1, %v183_v38  ;;  %v153_v46 = vadd.f32 %v121_v41, %v89_v40  ;;  %v59_v48 = vld [vmem:[%s1359_s0 + $0x99] sm:$0x3f]  ;;  %v60_v52 = vld [vmem:[%s1359_s0 + $0xa1] sm:$0xff]  ;;  %v62_v1 = vld [vmem:[%s1359_s0 + $0xb1] sm:$0xff] }
  0x1c   :  { %v91_v49 = vadd.f32 %v59_v48, %v27_v44  ;;  %218 = vst.msk [vmem:[#allocation2 + $0x81] sm:$0xff] %vm200_vm0, %v184_v45  ;;  %v92_v55 = vadd.f32 %v60_v52, %v28_v51  ;;  %v124_v56 = vld [vmem:[%s1359_s0 + $0xa2] sm:$0xff]  ;;  %v125_v60 = vld [vmem:[%s1359_s0 + $0xaa] sm:$0x3f]  ;;  %v186_v62 = vmul.f32 0.33333334, %v154_v54  ;;  %v94_v4 = vadd.f32 %v62_v1, %v30_v61 }
  0x1d   :  { %v185_v53 = vmul.f32 0.33333334, %v153_v46  ;;  %v29_v57 = vld [vmem:[%s1359_s0 + $0xa8] sm:$0x3f]  ;;  %v126_v2 = vld [vmem:[%s1359_s0 + $0xb2] sm:$0xff]  ;;  %v32_v11 = vld [vmem:[%s1359_s0 + $0xc0] sm:$0xff] }
  0x1e   :  { %v155_v58 = vadd.f32 %v123_v50, %v91_v49  ;;  %v61_v59 = vld [vmem:[%s1359_s0 + $0xa9] sm:$0x3f]  ;;  %v156_v63 = vadd.f32 %v124_v56, %v92_v55  ;;  %v31_v5 = vld [vmem:[%s1359_s0 + $0xb8] sm:$0x3f]  ;;  %220 = vst.msk [vmem:[#allocation2 + $0x91] sm:$0xff] %vm200_vm0, %v186_v62  ;;  %v158_v12 = vadd.f32 %v126_v2, %v94_v4  ;;  %v64_v13 = vld [vmem:[%s1359_s0 + $0xc1] sm:$0xff] }
  0x1f   :  { %219 = vst.msk [vmem:[#allocation2 + $0x89] sm:$0x3f] %vm202_vm1, %v185_v53  ;;  %v93_v0 = vadd.f32 %v61_v59, %v29_v57  ;;  %v63_v6 = vld [vmem:[%s1359_s0 + $0xb9] sm:$0x3f]  ;;  %v128_v14 = vld [vmem:[%s1359_s0 + $0xc2] sm:$0xff]  ;;  %v96_v18 = vadd.f32 %v64_v13, %v32_v11  ;;  %v34_v20 = vld [vmem:[%s1359_s0 + $0xd0] sm:$0xff] }
  0x20   :  { %v187_v3 = vmul.f32 0.33333334, %v155_v58  ;;  %v188_v7 = vmul.f32 0.33333334, %v156_v63  ;;  %v95_v9 = vadd.f32 %v63_v6, %v31_v5  ;;  %v127_v10 = vld [vmem:[%s1359_s0 + $0xba] sm:$0x3f] }
  0x21   :  { %v157_v8 = vadd.f32 %v125_v60, %v93_v0  ;;  %v33_v15 = vld [vmem:[%s1359_s0 + $0xc8] sm:$0x3f]  ;;  %v190_v21 = vmul.f32 0.33333334, %v158_v12  ;;  %v66_v24 = vld [vmem:[%s1359_s0 + $0xd1] sm:$0xff]  ;;  %v160_v27 = vadd.f32 %v128_v14, %v96_v18  ;;  %v36_v33 = vld [vmem:[%s1359_s0 + $0xe0] sm:$0xff] }
  0x22   :  { %221 = vst.msk [vmem:[#allocation2 + $0x99] sm:$0x3f] %vm202_vm1, %v187_v3  ;;  %v159_v17 = vadd.f32 %v127_v10, %v95_v9  ;;  %v65_v19 = vld [vmem:[%s1359_s0 + $0xc9] sm:$0x3f]  ;;  %v130_v25 = vld [vmem:[%s1359_s0 + $0xd2] sm:$0xff]  ;;  %v98_v28 = vadd.f32 %v66_v24, %v34_v20  ;;  %v68_v37 = vld [vmem:[%s1359_s0 + $0xe1] sm:$0xff] }
  0x23   :  { %222 = vst.msk [vmem:[#allocation2 + $0xa1] sm:$0xff] %vm200_vm0, %v188_v7  ;;  %v189_v16 = vmul.f32 0.33333334, %v157_v8  ;;  %v97_v22 = vadd.f32 %v65_v19, %v33_v15  ;;  %v129_v23 = vld [vmem:[%s1359_s0 + $0xca] sm:$0x3f]  ;;  %v132_v38 = vld [vmem:[%s1359_s0 + $0xe2] sm:$0xff]  ;;  %v100_v40 = vadd.f32 %v68_v37, %v36_v33 }
  0x24   :  { %v191_v26 = vmul.f32 0.33333334, %v159_v17  ;;  %v35_v29 = vld [vmem:[%s1359_s0 + $0xd8] sm:$0x3f]  ;;  %224 = vst.msk [vmem:[#allocation2 + $0xb1] sm:$0xff] %vm200_vm0, %v190_v21  ;;  %v162_v35 = vadd.f32 %v130_v25, %v98_v28  ;;  %v38_v47 = vld [vmem:[%s1359_s0 + $0xf0] sm:$0xff] }
  0x25   :  { %223 = vst.msk [vmem:[#allocation2 + $0xa9] sm:$0x3f] %vm202_vm1, %v189_v16  ;;  %v161_v30 = vadd.f32 %v129_v23, %v97_v22  ;;  %v67_v31 = vld [vmem:[%s1359_s0 + $0xd9] sm:$0x3f]  ;;  %v192_v34 = vmul.f32 0.33333334, %v160_v27  ;;  %v164_v48 = vadd.f32 %v132_v38, %v100_v40 }
  0x26   :  { %v131_v32 = vld [vmem:[%s1359_s0 + $0xda] sm:$0x3f]  ;;  %225 = vst.msk [vmem:[#allocation2 + $0xb9] sm:$0x3f] %vm202_vm1, %v191_v26  ;;  %v99_v36 = vadd.f32 %v67_v31, %v35_v29  ;;  %v37_v41 = vld [vmem:[%s1359_s0 + $0xe8] sm:$0x3f] }
  0x27   :  { %v193_v39 = vmul.f32 0.33333334, %v161_v30  ;;  %v69_v42 = vld [vmem:[%s1359_s0 + $0xe9] sm:$0x3f]  ;;  %226 = vst.msk [vmem:[#allocation2 + $0xc1] sm:$0xff] %vm200_vm0, %v192_v34  ;;  %v70_v49 = vld [vmem:[%s1359_s0 + $0xf1] sm:$0xff] }
  0x28   :  { %v194_v43 = vmul.f32 0.33333334, %v162_v35  ;;  %v163_v44 = vadd.f32 %v131_v32, %v99_v36  ;;  %v101_v45 = vadd.f32 %v69_v42, %v37_v41  ;;  %v133_v46 = vld [vmem:[%s1359_s0 + $0xea] sm:$0x3f]  ;;  %v134_v50 = vld [vmem:[%s1359_s0 + $0xf2] sm:$0xff]  ;;  %v102_v54 = vadd.f32 %v70_v49, %v38_v47 }
  0x29   :  { %227 = vst.msk [vmem:[#allocation2 + $0xc9] sm:$0x3f] %vm202_vm1, %v193_v39  ;;  %v39_v51 = vld [vmem:[%s1359_s0 + $0xf8] sm:$0x3f]  ;;  %v196_v56 = vmul.f32 0.33333334, %v164_v48 }
  0x2a   :  { %228 = vst.msk [vmem:[#allocation2 + $0xd1] sm:$0xff] %vm200_vm0, %v194_v43  ;;  %v195_v52 = vmul.f32 0.33333334, %v163_v44  ;;  %v165_v53 = vadd.f32 %v133_v46, %v101_v45  ;;  %v71_v55 = vld [vmem:[%s1359_s0 + $0xf9] sm:$0x3f]  ;;  %v166_v61 = vadd.f32 %v134_v50, %v102_v54 }
  0x2b   :  { %v103_v57 = vadd.f32 %v71_v55, %v39_v51  ;;  %v135_v58 = vld [vmem:[%s1359_s0 + $0xfa] sm:$0x3f]  ;;  %v234_v59 = vld [vmem:[%s1359_s0] sm:$0x1]  ;;  %v250_v62 = vld [vmem:[%s1359_s0 + $0x1] sm:$0x1] }
  0x2c   :  { %229 = vst.msk [vmem:[#allocation2 + $0xd9] sm:$0x3f] %vm202_vm1, %v195_v52  ;;  %v197_v60 = vmul.f32 0.33333334, %v165_v53  ;;  %v266_v0 = vadd.f32 %v250_v62, %v234_v59  ;;  %v235_v1 = vld [vmem:[%s1359_s0 + $0x10] sm:$0x1] }
  0x2d   :  { %230 = vst.msk [vmem:[#allocation2 + $0xe1] sm:$0xff] %vm200_vm0, %v196_v56  ;;  %v167_v63 = vadd.f32 %v135_v58, %v103_v57  ;;  %v251_v2 = vld [vmem:[%s1359_s0 + $0x11] sm:$0x1]  ;;  %v198_v3 = vmul.f32 0.33333334, %v166_v61 }
  0x2e   :  { %231 = vst.msk [vmem:[#allocation2 + $0xe9] sm:$0x3f] %vm202_vm1, %v197_v60  ;;  %v267_v4 = vadd.f32 %v251_v2, %v235_v1  ;;  %v236_v5 = vld [vmem:[%s1359_s0 + $0x20] sm:$0x1]  ;;  %v282_v7 = vmul.f32 0.5, %v266_v0 }
  0x2f   :  { %v199_v6 = vmul.f32 0.33333334, %v167_v63  ;;  %v252_v8 = vld [vmem:[%s1359_s0 + $0x21] sm:$0x1]  ;;  %232 = vst.msk [vmem:[#allocation2 + $0xf1] sm:$0xff] %vm200_vm0, %v198_v3 }
  0x30   :  { %v283_v9 = vmul.f32 0.5, %v267_v4  ;;  %v268_v10 = vadd.f32 %v252_v8, %v236_v5  ;;  %v237_v11 = vld [vmem:[%s1359_s0 + $0x30] sm:$0x1]  ;;  %v253_v12 = vld [vmem:[%s1359_s0 + $0x31] sm:$0x1] }
  0x31   :  { %233 = vst.msk [vmem:[#allocation2 + $0xf9] sm:$0x3f] %vm202_vm1, %v199_v6  ;;  %v269_v13 = vadd.f32 %v253_v12, %v237_v11  ;;  %v238_v14 = vld [vmem:[%s1359_s0 + $0x40] sm:$0x1]  ;;  %v254_v15 = vld [vmem:[%s1359_s0 + $0x41] sm:$0x1] }
  0x32   :  { %299 = vst.msk [vmem:[#allocation2] sm:$0x1] %vm298_vm2, %v282_v7  ;;  %v284_v16 = vmul.f32 0.5, %v268_v10  ;;  %v270_v17 = vadd.f32 %v254_v15, %v238_v14  ;;  %v239_v18 = vld [vmem:[%s1359_s0 + $0x50] sm:$0x1] }
  0x33   :  { %300 = vst.msk [vmem:[#allocation2 + $0x10] sm:$0x1] %vm298_vm2, %v283_v9  ;;  %v285_v19 = vmul.f32 0.5, %v269_v13  ;;  %v255_v20 = vld [vmem:[%s1359_s0 + $0x51] sm:$0x1] }
  0x34   :  { %301 = vst.msk [vmem:[#allocation2 + $0x20] sm:$0x1] %vm298_vm2, %v284_v16  ;;  %v286_v21 = vmul.f32 0.5, %v270_v17  ;;  %v271_v22 = vadd.f32 %v255_v20, %v239_v18  ;;  %v240_v23 = vld [vmem:[%s1359_s0 + $0x60] sm:$0x1] }
  0x35   :  { %302 = vst.msk [vmem:[#allocation2 + $0x30] sm:$0x1] %vm298_vm2, %v285_v19  ;;  %v256_v24 = vld [vmem:[%s1359_s0 + $0x61] sm:$0x1]  ;;  %v241_v25 = vld [vmem:[%s1359_s0 + $0x70] sm:$0x1] }
  0x36   :  { %303 = vst.msk [vmem:[#allocation2 + $0x40] sm:$0x1] %vm298_vm2, %v286_v21  ;;  %v287_v26 = vmul.f32 0.5, %v271_v22  ;;  %v272_v27 = vadd.f32 %v256_v24, %v240_v23  ;;  %v257_v28 = vld [vmem:[%s1359_s0 + $0x71] sm:$0x1] }
  0x37   :  { %v273_v29 = vadd.f32 %v257_v28, %v241_v25  ;;  %v242_v30 = vld [vmem:[%s1359_s0 + $0x80] sm:$0x1]  ;;  %v258_v31 = vld [vmem:[%s1359_s0 + $0x81] sm:$0x1]  ;;  %v243_v32 = vld [vmem:[%s1359_s0 + $0x90] sm:$0x1] }
  0x38   :  { %304 = vst.msk [vmem:[#allocation2 + $0x50] sm:$0x1] %vm298_vm2, %v287_v26  ;;  %v288_v33 = vmul.f32 0.5, %v272_v27  ;;  %v274_v34 = vadd.f32 %v258_v31, %v242_v30  ;;  %v259_v35 = vld [vmem:[%s1359_s0 + $0x91] sm:$0x1] }
  0x39   :  { %v289_v36 = vmul.f32 0.5, %v273_v29  ;;  %v275_v37 = vadd.f32 %v259_v35, %v243_v32  ;;  %v244_v38 = vld [vmem:[%s1359_s0 + $0xa0] sm:$0x1]  ;;  %v260_v39 = vld [vmem:[%s1359_s0 + $0xa1] sm:$0x1] }
  0x3a   :  { %305 = vst.msk [vmem:[#allocation2 + $0x60] sm:$0x1] %vm298_vm2, %v288_v33  ;;  %v290_v40 = vmul.f32 0.5, %v274_v34  ;;  %v276_v41 = vadd.f32 %v260_v39, %v244_v38  ;;  %v245_v42 = vld [vmem:[%s1359_s0 + $0xb0] sm:$0x1]  ;;  %v594_v45 = vld [vmem:[#allocation2] sm:$0xff] }
  0x3b   :  { %306 = vst.msk [vmem:[#allocation2 + $0x70] sm:$0x1] %vm298_vm2, %v289_v36  ;;  %v291_v43 = vmul.f32 0.5, %v275_v37  ;;  %v261_v44 = vld [vmem:[%s1359_s0 + $0xb1] sm:$0x1] }
  0x3c   :  { %307 = vst.msk [vmem:[#allocation2 + $0x80] sm:$0x1] %vm298_vm2, %v290_v40  ;;  %v292_v46 = vmul.f32 0.5, %v276_v41  ;;  %v277_v47 = vadd.f32 %v261_v44, %v245_v42  ;;  %v246_v48 = vld [vmem:[%s1359_s0 + $0xc0] sm:$0x1]  ;;  %v1065_v49 = vld [vmem:[#allocation2 + $0x10] sm:$0xff] }
  0x3d   :  { %308 = vst.msk [vmem:[#allocation2 + $0x90] sm:$0x1] %vm298_vm2, %v291_v43  ;;  %v262_v50 = vld [vmem:[%s1359_s0 + $0xc1] sm:$0x1]  ;;  %v247_v51 = vld [vmem:[%s1359_s0 + $0xd0] sm:$0x1]  ;;  %v1092_v62 = vadd.f32 %v1065_v49, %v594_v45 }
  0x3e   :  { %309 = vst.msk [vmem:[#allocation2 + $0xa0] sm:$0x1] %vm298_vm2, %v292_v46  ;;  %v293_v52 = vmul.f32 0.5, %v277_v47  ;;  %v278_v53 = vadd.f32 %v262_v50, %v246_v48  ;;  %v263_v54 = vld [vmem:[%s1359_s0 + $0xd1] sm:$0x1]  ;;  %v481_v41 = vld [vmem:[#allocation2 + $0x20] sm:$0xff] }
  0x3f   :  { %v279_v55 = vadd.f32 %v263_v54, %v247_v51  ;;  %v248_v56 = vld [vmem:[%s1359_s0 + $0xe0] sm:$0x1]  ;;  %v264_v57 = vld [vmem:[%s1359_s0 + $0xe1] sm:$0x1]  ;;  %v249_v58 = vld [vmem:[%s1359_s0 + $0xf0] sm:$0x1] }
  0x40   :  { %310 = vst.msk [vmem:[#allocation2 + $0xb0] sm:$0x1] %vm298_vm2, %v293_v52  ;;  %v294_v59 = vmul.f32 0.5, %v278_v53  ;;  %v280_v60 = vadd.f32 %v264_v57, %v248_v56  ;;  %v265_v61 = vld [vmem:[%s1359_s0 + $0xf1] sm:$0x1]  ;;  %v600_v11 = vmul.f32 0.5, %v1092_v62 }
  0x41   :  { %v295_v63 = vmul.f32 0.5, %v279_v55  ;;  %v281_v0 = vadd.f32 %v265_v61, %v249_v58  ;;  %v315_v1 = vld [vmem:[%s1359_s0 + $0xe] sm:$0x1]  ;;  %v331_v2 = vld [vmem:[%s1359_s0 + $0xf] sm:$0x1]  ;;  %v483_v46 = vld [vmem:[#allocation2 + $0x30] sm:$0xff] }
  0x42   :  { %311 = vst.msk [vmem:[#allocation2 + $0xc0] sm:$0x1] %vm298_vm2, %v294_v59  ;;  %v296_v3 = vmul.f32 0.5, %v280_v60  ;;  %v347_v4 = vadd.f32 %v331_v2, %v315_v1  ;;  %v316_v5 = vld [vmem:[%s1359_s0 + $0x1e] sm:$0x1] }
  0x43   :  { %312 = vst.msk [vmem:[#allocation2 + $0xd0] sm:$0x1] %vm298_vm2, %v295_v63  ;;  %v297_v6 = vmul.f32 0.5, %v281_v0  ;;  %v332_v7 = vld [vmem:[%s1359_s0 + $0x1f] sm:$0x1]  ;;  %v485_v63 = vld [vmem:[#allocation2 + $0x40] sm:$0xff] }
  0x44   :  { %313 = vst.msk [vmem:[#allocation2 + $0xe0] sm:$0x1] %vm298_vm2, %v296_v3  ;;  %v363_v8 = vmul.f32 0.5, %v347_v4  ;;  %v348_v9 = vadd.f32 %v332_v7, %v316_v5  ;;  %v317_v10 = vld [vmem:[%s1359_s0 + $0x2e] sm:$0x1]  ;;  %v454_v4 = vadd.f32 %v1065_v49, %v481_v41  ;;  %v509_v49 = vadd.f32 %v1092_v62, %v481_v41 }
  0x45   :  { %314 = vst.msk [vmem:[#allocation2 + $0xf0] sm:$0x1] %vm298_vm2, %v297_v6  ;;  %v333_v12 = vld [vmem:[%s1359_s0 + $0x2f] sm:$0x1]  ;;  %v318_v13 = vld [vmem:[%s1359_s0 + $0x3e] sm:$0x1] }
  0x46   :  { %379 = vst.msk [vmem:[#allocation2 + $0xf] sm:$0x1] %vm298_vm2, %v363_v8  ;;  %v364_v14 = vmul.f32 0.5, %v348_v9  ;;  %v349_v15 = vadd.f32 %v333_v12, %v317_v10  ;;  %v334_v16 = vld [vmem:[%s1359_s0 + $0x3f] sm:$0x1]  ;;  %v456_v9 = vadd.f32 %v483_v46, %v481_v41  ;;  %v487_v10 = vld [vmem:[#allocation2 + $0x50] sm:$0xff] }
  0x47   :  { %v350_v17 = vadd.f32 %v334_v16, %v318_v13  ;;  %v319_v18 = vld [vmem:[%s1359_s0 + $0x4e] sm:$0x1]  ;;  %v335_v19 = vld [vmem:[%s1359_s0 + $0x4f] sm:$0x1]  ;;  %v320_v20 = vld [vmem:[%s1359_s0 + $0x5e] sm:$0x1] }
  0x48   :  { %380 = vst.msk [vmem:[#allocation2 + $0x1f] sm:$0x1] %vm298_vm2, %v364_v14  ;;  %v365_v21 = vmul.f32 0.5, %v349_v15  ;;  %v351_v22 = vadd.f32 %v335_v19, %v319_v18  ;;  %v336_v23 = vld [vmem:[%s1359_s0 + $0x5f] sm:$0x1] }
  0x49   :  { %v366_v24 = vmul.f32 0.5, %v350_v17  ;;  %v352_v25 = vadd.f32 %v336_v23, %v320_v20  ;;  %v321_v26 = vld [vmem:[%s1359_s0 + $0x6e] sm:$0x1]  ;;  %v337_v27 = vld [vmem:[%s1359_s0 + $0x6f] sm:$0x1]  ;;  %602 = vst.msk [vmem:[%s1360_s1] sm:$0xff] %vm200_vm0, %v600_v11  ;;  %v458_v23 = vadd.f32 %v485_v63, %v483_v46 }
  0x4a   :  { %381 = vst.msk [vmem:[#allocation2 + $0x2f] sm:$0x1] %vm298_vm2, %v365_v21  ;;  %v367_v28 = vmul.f32 0.5, %v351_v22  ;;  %v353_v29 = vadd.f32 %v337_v27, %v321_v26  ;;  %v322_v30 = vld [vmem:[%s1359_s0 + $0x7e] sm:$0x1]  ;;  %v511_v21 = vadd.f32 %v483_v46, %v454_v4  ;;  %v513_v26 = vadd.f32 %v485_v63, %v456_v9 }
  0x4b   :  { %382 = vst.msk [vmem:[#allocation2 + $0x3f] sm:$0x1] %vm298_vm2, %v366_v24  ;;  %v368_v31 = vmul.f32 0.5, %v352_v25  ;;  %v338_v32 = vld [vmem:[%s1359_s0 + $0x7f] sm:$0x1]  ;;  %v1155_v33 = vld [vmem:[#allocation2 + $0xe0] sm:$0xff]  ;;  %v515_v41 = vadd.f32 %v487_v10, %v458_v23 }
  0x4c   :  { %383 = vst.msk [vmem:[#allocation2 + $0x4f] sm:$0x1] %vm298_vm2, %v367_v28  ;;  %v369_v34 = vmul.f32 0.5, %v353_v29  ;;  %v354_v35 = vadd.f32 %v338_v32, %v322_v30  ;;  %v323_v36 = vld [vmem:[%s1359_s0 + $0x8e] sm:$0x1]  ;;  %v1161_v37 = vld [vmem:[#allocation2 + $0xf0] sm:$0xff]  ;;  %v460_v32 = vadd.f32 %v487_v10, %v485_v63 }
  0x4d   :  { %384 = vst.msk [vmem:[#allocation2 + $0x5f] sm:$0x1] %vm298_vm2, %v368_v31  ;;  %v339_v38 = vld [vmem:[%s1359_s0 + $0x8f] sm:$0x1]  ;;  %v324_v39 = vld [vmem:[%s1359_s0 + $0x9e] sm:$0x1]  ;;  %v610_v40 = vadd.f32 %v1161_v37, %v1155_v33 }
  0x4e   :  { %385 = vst.msk [vmem:[#allocation2 + $0x6f] sm:$0x1] %vm298_vm2, %v369_v34  ;;  %v370_v42 = vmul.f32 0.5, %v354_v35  ;;  %v355_v43 = vadd.f32 %v339_v38, %v323_v36  ;;  %v340_v44 = vld [vmem:[%s1359_s0 + $0x9f] sm:$0x1]  ;;  %v595_v45 = vld [vmem:[#allocation2 + $0x8] sm:$0xff] }
  0x4f   :  { %v356_v47 = vadd.f32 %v340_v44, %v324_v39  ;;  %v325_v48 = vld [vmem:[%s1359_s0 + $0xae] sm:$0x1]  ;;  %v341_v50 = vld [vmem:[%s1359_s0 + $0xaf] sm:$0x1]  ;;  %v326_v51 = vld [vmem:[%s1359_s0 + $0xbe] sm:$0x1] }
  0x50   :  { %386 = vst.msk [vmem:[#allocation2 + $0x7f] sm:$0x1] %vm298_vm2, %v370_v42  ;;  %v371_v52 = vmul.f32 0.5, %v355_v43  ;;  %v357_v53 = vadd.f32 %v341_v50, %v325_v48  ;;  %v342_v54 = vld [vmem:[%s1359_s0 + $0xbf] sm:$0x1]  ;;  %v612_v61 = vmul.f32 0.5, %v610_v40 }
  0x51   :  { %v597_v55 = vld [vmem:[#allocation2 + $0x18] sm:$0xff]  ;;  %v372_v56 = vmul.f32 0.5, %v356_v47  ;;  %v358_v57 = vadd.f32 %v342_v54, %v326_v51  ;;  %v327_v58 = vld [vmem:[%s1359_s0 + $0xce] sm:$0x1]  ;;  %v343_v59 = vld [vmem:[%s1359_s0 + $0xcf] sm:$0x1] }
  0x52   :  { %v599_v60 = vadd.f32 %v597_v55, %v595_v45  ;;  %387 = vst.msk [vmem:[#allocation2 + $0x8f] sm:$0x1] %vm298_vm2, %v371_v52  ;;  %v373_v0 = vmul.f32 0.5, %v357_v53  ;;  %v359_v1 = vadd.f32 %v343_v59, %v327_v58  ;;  %v328_v2 = vld [vmem:[%s1359_s0 + $0xde] sm:$0x1]  ;;  %v482_v3 = vld [vmem:[#allocation2 + $0x28] sm:$0xff] }
  0x53   :  { %388 = vst.msk [vmem:[#allocation2 + $0x9f] sm:$0x1] %vm298_vm2, %v372_v56  ;;  %v374_v5 = vmul.f32 0.5, %v358_v57  ;;  %v344_v6 = vld [vmem:[%s1359_s0 + $0xdf] sm:$0x1]  ;;  %v455_v8 = vadd.f32 %v597_v55, %v482_v3  ;;  %v486_v22 = vld [vmem:[#allocation2 + $0x48] sm:$0xff] }
  0x54   :  { %v601_v7 = vmul.f32 0.5, %v599_v60  ;;  %389 = vst.msk [vmem:[#allocation2 + $0xaf] sm:$0x1] %vm298_vm2, %v373_v0  ;;  %v375_v11 = vmul.f32 0.5, %v359_v1  ;;  %v360_v12 = vadd.f32 %v344_v6, %v328_v2  ;;  %v329_v13 = vld [vmem:[%s1359_s0 + $0xee] sm:$0x1]  ;;  %v510_v17 = vadd.f32 %v599_v60, %v482_v3 }
  0x55   :  { %v484_v14 = vld [vmem:[#allocation2 + $0x38] sm:$0xff]  ;;  %390 = vst.msk [vmem:[#allocation2 + $0xbf] sm:$0x1] %vm298_vm2, %v374_v5  ;;  %v345_v15 = vld [vmem:[%s1359_s0 + $0xef] sm:$0x1]  ;;  %v489_v28 = vld [vmem:[#allocation2 + $0x60] sm:$0xff] }
  0x56   :  { %v330_v16 = vld [vmem:[%s1359_s0 + $0xfe] sm:$0x1]  ;;  %v457_v18 = vadd.f32 %v484_v14, %v482_v3  ;;  %391 = vst.msk [vmem:[#allocation2 + $0xcf] sm:$0x1] %vm298_vm2, %v375_v11  ;;  %v376_v19 = vmul.f32 0.5, %v360_v12  ;;  %v361_v20 = vadd.f32 %v345_v15, %v329_v13  ;;  %v512_v25 = vadd.f32 %v484_v14, %v455_v8  ;;  %v490_v39 = vld [vmem:[#allocation2 + $0x68] sm:$0xff] }
  0x57   :  { %v346_v62 = vld [vmem:[%s1359_s0 + $0xff] sm:$0x1]  ;;  %603 = vst.msk [vmem:[%s1360_s1 + $0x8] sm:$0xff] %vm200_vm0, %v601_v7  ;;  %v537_v30 = vmul.f32 0.33333334, %v509_v49  ;;  %v459_v31 = vadd.f32 %v486_v22, %v484_v14  ;;  %v462_v42 = vadd.f32 %v489_v28, %v487_v10  ;;  %v491_v43 = vld [vmem:[#allocation2 + $0x70] sm:$0xff]  ;;  %v517_v47 = vadd.f32 %v489_v28, %v460_v32 }
  0x58   :  { %v362_v24 = vadd.f32 %v346_v62, %v330_v16  ;;  %v488_v27 = vld [vmem:[#allocation2 + $0x58] sm:$0xff]  ;;  %392 = vst.msk [vmem:[#allocation2 + $0xdf] sm:$0x1] %vm298_vm2, %v376_v19  ;;  %v377_v29 = vmul.f32 0.5, %v361_v20  ;;  %v538_v35 = vmul.f32 0.33333334, %v510_v17  ;;  %v514_v36 = vadd.f32 %v486_v22, %v457_v18 }
  0x59   :  { %649 = vst.msk [vmem:[%s1360_s1 + $0xf0] sm:$0xff] %vm200_vm0, %v612_v61  ;;  %v461_v38 = vadd.f32 %v488_v27, %v486_v22  ;;  %v539_v40 = vmul.f32 0.33333334, %v511_v21  ;;  %v540_v44 = vmul.f32 0.33333334, %v512_v25  ;;  %v516_v45 = vadd.f32 %v488_v27, %v459_v31  ;;  %v492_v50 = vld [vmem:[#allocation2 + $0x78] sm:$0xff] }
  0x5a   :  { %v378_v34 = vmul.f32 0.5, %v362_v24  ;;  %393 = vst.msk [vmem:[#allocation2 + $0xef] sm:$0x1] %vm298_vm2, %v377_v29  ;;  %v541_v46 = vmul.f32 0.33333334, %v513_v26  ;;  %v463_v48 = vadd.f32 %v490_v39, %v488_v27  ;;  %v464_v53 = vadd.f32 %v491_v43, %v489_v28  ;;  %v493_v54 = vld [vmem:[#allocation2 + $0x80] sm:$0xff] }
  0x5b   :  { %621 = vst.msk [vmem:[%s1360_s1 + $0x10] sm:$0xff] %vm200_vm0, %v537_v30  ;;  %v542_v51 = vmul.f32 0.33333334, %v514_v36  ;;  %v518_v52 = vadd.f32 %v490_v39, %v461_v38  ;;  %v494_v55 = vld [vmem:[#allocation2 + $0x88] sm:$0xff]  ;;  %v543_v56 = vmul.f32 0.33333334, %v515_v41  ;;  %v519_v57 = vadd.f32 %v491_v43, %v462_v42 }
  0x5c   :  { %394 = vst.msk [vmem:[#allocation2 + $0xff] sm:$0x1] %vm298_vm2, %v378_v34  ;;  %v465_v58 = vadd.f32 %v492_v50, %v490_v39  ;;  %v495_v59 = vld [vmem:[#allocation2 + $0x90] sm:$0xff]  ;;  %v544_v60 = vmul.f32 0.33333334, %v516_v45  ;;  %v466_v61 = vadd.f32 %v493_v54, %v491_v43  ;;  %v496_v63 = vld [vmem:[#allocation2 + $0x98] sm:$0xff]  ;;  %v520_v1 = vadd.f32 %v492_v50, %v463_v48 }
  0x5d   :  { %622 = vst.msk [vmem:[%s1360_s1 + $0x18] sm:$0xff] %vm200_vm0, %v538_v35  ;;  %v545_v0 = vmul.f32 0.33333334, %v517_v47  ;;  %v467_v2 = vadd.f32 %v494_v55, %v492_v50  ;;  %v497_v3 = vld [vmem:[#allocation2 + $0xa0] sm:$0xff]  ;;  %v546_v5 = vmul.f32 0.33333334, %v518_v52  ;;  %v521_v6 = vadd.f32 %v493_v54, %v464_v53 }
  0x5e   :  { %623 = vst.msk [vmem:[%s1360_s1 + $0x20] sm:$0xff] %vm200_vm0, %v539_v40  ;;  %v468_v7 = vadd.f32 %v495_v59, %v493_v54  ;;  %v498_v8 = vld [vmem:[#allocation2 + $0xa8] sm:$0xff]  ;;  %v547_v10 = vmul.f32 0.33333334, %v519_v57  ;;  %v522_v11 = vadd.f32 %v494_v55, %v465_v58  ;;  %v469_v12 = vadd.f32 %v496_v63, %v494_v55  ;;  %v499_v13 = vld [vmem:[#allocation2 + $0xb0] sm:$0xff]  ;;  %v500_v16 = vld [vmem:[#allocation2 + $0xb8] sm:$0xff] }
  0x5f   :  { %624 = vst.msk [vmem:[%s1360_s1 + $0x28] sm:$0xff] %vm200_vm0, %v540_v44  ;;  %v523_v14 = vadd.f32 %v495_v59, %v466_v61  ;;  %v470_v15 = vadd.f32 %v497_v3, %v495_v59  ;;  %v548_v17 = vmul.f32 0.33333334, %v520_v1  ;;  %v524_v18 = vadd.f32 %v496_v63, %v467_v2  ;;  %v501_v20 = vld [vmem:[#allocation2 + $0xc0] sm:$0xff]  ;;  %v502_v24 = vld [vmem:[#allocation2 + $0xc8] sm:$0xff]  ;;  %v503_v28 = vld [vmem:[#allocation2 + $0xd0] sm:$0xff] }
  0x60   :  { %625 = vst.msk [vmem:[%s1360_s1 + $0x30] sm:$0xff] %vm200_vm0, %v541_v46  ;;  %v471_v19 = vadd.f32 %v498_v8, %v496_v63  ;;  %v549_v21 = vmul.f32 0.33333334, %v521_v6  ;;  %v525_v22 = vadd.f32 %v497_v3, %v468_v7  ;;  %v472_v23 = vadd.f32 %v499_v13, %v497_v3  ;;  %v504_v32 = vld [vmem:[#allocation2 + $0xd8] sm:$0xff] }
  0x61   :  { %v1251_v4 = vld [vmem:[#allocation2 + $0xe8] sm:$0xff]  ;;  %626 = vst.msk [vmem:[%s1360_s1 + $0x38] sm:$0xff] %vm200_vm0, %v542_v51  ;;  %v550_v25 = vmul.f32 0.33333334, %v522_v11  ;;  %v526_v26 = vadd.f32 %v498_v8, %v469_v12  ;;  %v473_v27 = vadd.f32 %v500_v16, %v498_v8  ;;  %v551_v29 = vmul.f32 0.33333334, %v523_v14 }
  0x62   :  { %627 = vst.msk [vmem:[%s1360_s1 + $0x40] sm:$0xff] %vm200_vm0, %v543_v56  ;;  %v527_v30 = vadd.f32 %v499_v13, %v470_v15  ;;  %v474_v31 = vadd.f32 %v501_v20, %v499_v13  ;;  %v552_v34 = vmul.f32 0.33333334, %v524_v18  ;;  %v528_v35 = vadd.f32 %v500_v16, %v471_v19 }
  0x63   :  { %v1257_v9 = vld [vmem:[#allocation2 + $0xf8] sm:$0xff]  ;;  %628 = vst.msk [vmem:[%s1360_s1 + $0x48] sm:$0xff] %vm200_vm0, %v544_v60  ;;  %v475_v36 = vadd.f32 %v502_v24, %v500_v16  ;;  %v553_v38 = vmul.f32 0.33333334, %v525_v22  ;;  %v529_v39 = vadd.f32 %v501_v20, %v472_v23  ;;  %v476_v40 = vadd.f32 %v503_v28, %v501_v20 }
  0x64   :  { %v611_v49 = vadd.f32 %v1257_v9, %v1251_v4  ;;  %629 = vst.msk [vmem:[%s1360_s1 + $0x50] sm:$0xff] %vm200_vm0, %v545_v0  ;;  %v554_v41 = vmul.f32 0.33333334, %v526_v26  ;;  %v530_v42 = vadd.f32 %v502_v24, %v473_v27  ;;  %v477_v43 = vadd.f32 %v504_v32, %v502_v24 }
  0x65   :  { %630 = vst.msk [vmem:[%s1360_s1 + $0x58] sm:$0xff] %vm200_vm0, %v546_v5  ;;  %v555_v44 = vmul.f32 0.33333334, %v527_v30  ;;  %v531_v45 = vadd.f32 %v503_v28, %v474_v31  ;;  %v478_v46 = vadd.f32 %v1155_v33, %v503_v28  ;;  %v556_v47 = vmul.f32 0.33333334, %v528_v35 }
  0x66   :  { %v613_v62 = vmul.f32 0.5, %v611_v49  ;;  %631 = vst.msk [vmem:[%s1360_s1 + $0x60] sm:$0xff] %vm200_vm0, %v547_v10  ;;  %v532_v48 = vadd.f32 %v504_v32, %v475_v36  ;;  %v479_v50 = vadd.f32 %v1251_v4, %v504_v32  ;;  %v557_v51 = vmul.f32 0.33333334, %v529_v39 }
  0x67   :  { %632 = vst.msk [vmem:[%s1360_s1 + $0x68] sm:$0xff] %vm200_vm0, %v548_v17  ;;  %v533_v52 = vadd.f32 %v1155_v33, %v476_v40  ;;  %v558_v53 = vmul.f32 0.33333334, %v530_v42  ;;  %v534_v54 = vadd.f32 %v1251_v4, %v477_v43  ;;  %v559_v55 = vmul.f32 0.33333334, %v531_v45 }
  0x68   :  { %650 = vst.msk [vmem:[%s1360_s1 + $0xf8] sm:$0xff] %vm200_vm0, %v613_v62  ;;  %v535_v56 = vadd.f32 %v1161_v37, %v478_v46  ;;  %v560_v33 = vmul.f32 0.33333334, %v532_v48  ;;  %v536_v57 = vadd.f32 %v1257_v9, %v479_v50 }
  0x69   :  { %633 = vst.msk [vmem:[%s1360_s1 + $0x70] sm:$0xff] %vm200_vm0, %v549_v21  ;;  %v561_v58 = vmul.f32 0.33333334, %v533_v52  ;;  %v562_v37 = vmul.f32 0.33333334, %v534_v54 }
  0x6a   :  { %634 = vst.msk [vmem:[%s1360_s1 + $0x78] sm:$0xff] %vm200_vm0, %v550_v25  ;;  %v563_v59 = vmul.f32 0.33333334, %v535_v56  ;;  %v564_v60 = vmul.f32 0.33333334, %v536_v57 }
  0x6b   :  { %635 = vst.msk [vmem:[%s1360_s1 + $0x80] sm:$0xff] %vm200_vm0, %v551_v29 }
  0x6c   :  { %636 = vst.msk [vmem:[%s1360_s1 + $0x88] sm:$0xff] %vm200_vm0, %v552_v34 }
  0x6d   :  { %637 = vst.msk [vmem:[%s1360_s1 + $0x90] sm:$0xff] %vm200_vm0, %v553_v38 }
  0x6e   :  { %638 = vst.msk [vmem:[%s1360_s1 + $0x98] sm:$0xff] %vm200_vm0, %v554_v41 }
  0x6f   :  { %639 = vst.msk [vmem:[%s1360_s1 + $0xa0] sm:$0xff] %vm200_vm0, %v555_v44 }
  0x70   :  { %640 = vst.msk [vmem:[%s1360_s1 + $0xa8] sm:$0xff] %vm200_vm0, %v556_v47 }
  0x71   :  { %641 = vst.msk [vmem:[%s1360_s1 + $0xb0] sm:$0xff] %vm200_vm0, %v557_v51 }
  0x72   :  { %642 = vst.msk [vmem:[%s1360_s1 + $0xb8] sm:$0xff] %vm200_vm0, %v558_v53 }
  0x73   :  { %643 = vst.msk [vmem:[%s1360_s1 + $0xc0] sm:$0xff] %vm200_vm0, %v559_v55 }
  0x74   :  { %644 = vst.msk [vmem:[%s1360_s1 + $0xc8] sm:$0xff] %vm200_vm0, %v560_v33 }
  0x75   :  { %645 = vst.msk [vmem:[%s1360_s1 + $0xd0] sm:$0xff] %vm200_vm0, %v561_v58 }
  0x76   :  { %646 = vst.msk [vmem:[%s1360_s1 + $0xd8] sm:$0xff] %vm200_vm0, %v562_v37 }
  0x77   :  { %647 = vst.msk [vmem:[%s1360_s1 + $0xe0] sm:$0xff] %vm200_vm0, %v563_v59 }
  0x78   :  { %648 = vst.msk [vmem:[%s1360_s1 + $0xe8] sm:$0xff] %vm200_vm0, %v564_v60 }

</bundles_post_ra>
